<compile_context>
chip_gen: v7x
topology: tpu7x:2x2x1
jax: 0.10.0
libtpu: 0.0.40
codegen_flags: <defaults>
</compile_context>

<pallas_src>
import numpy as np
import jax
import jax.numpy as jnp
from jax.experimental import pallas as pl
from jax.experimental.pallas import tpu as pltpu


def _make_balance_weights(class_num, alpha=None, beta=0.99):
    """Replicates the __init__ weight computation of BCE_balance_Loss."""
    if alpha is None:
        alpha = np.ones((class_num,), dtype=np.float64)
    else:
        alpha = np.array(alpha, dtype=np.float64)
    effective_num = 1.0 - np.power(beta, alpha)
    weights = (1.0 - beta) / effective_num
    weights = weights / np.sum(weights) * class_num
    return weights.astype(np.float32)  # (C,)


def _bce_balance_kernel(logits_ref, targets_ref, weight_ref, out_ref):
    # Up-cast in-kernel: HBM reads stay in the native (possibly bf16) dtype.
    x = logits_ref[...].astype(jnp.float32)       # (TILE_N, C)
    t = targets_ref[...]                          # (TILE_N, 1) int32
    w = weight_ref[...]                           # (1, C) f32 class weights

    n, c = x.shape
    col = jax.lax.broadcasted_iota(jnp.int32, (n, c), 1)

    # Numerically-stable BCE-with-logits against a one-hot target without
    # materializing the one-hot:
    #   loss_ij = max(x,0) - x * [j == t_i] + log1p(exp(-|x|))
    softplus = jnp.maximum(x, 0.0) + jnp.log1p(jnp.exp(-jnp.abs(x)))
    bce = jnp.where(col == t, softplus - x, softplus)

    # weight-broadcast * BCE, summed over classes -> lane-dense row store.
    batch_loss = jnp.sum(w * bce, axis=1)         # (TILE_N,)
    out_ref[0, 0, :] = batch_loss

    # TODO(synk): for C < 128 a further ~(128//C)x win is available by packing
    # multiple samples into the lane axis (G = 128 // C groups per vreg row);
    # requires masking the padded lanes' weights, left out for clarity.


def _choose_tile_n(n, c, itemsize):
    # ~2 MiB per logits tile (double-buffered by the pipeline) stays resident
    # even on v7x's 64 MiB VMEM; rounded to a sublane multiple of 8.
    target_bytes = 2 * 1024 * 1024
    tile = max(8, min(1024, target_bytes // max(1, c * itemsize)))
    tile = (int(tile) // 8) * 8
    n_pad8 = ((n + 7) // 8) * 8
    return n_pad8 if n_pad8 <= tile else tile


def bce_balance_loss(logits, targets, weights, size_average=None, tile_n=None):
    """logits: (N, C), targets: (N,) int, weights: (C,) f32."""
    n, c = logits.shape
    itemsize = jnp.dtype(logits.dtype).itemsize
    if tile_n is None:
        tile_n = _choose_tile_n(n, c, itemsize)
    tile_n = max(8, (int(tile_n) // 8) * 8)

    n_pad = ((n + tile_n - 1) // tile_n) * tile_n
    num_tiles = n_pad // tile_n

    logits_p = logits
    targets_p = targets.astype(jnp.int32)
    if n_pad != n:
        logits_p = jnp.pad(logits_p, ((0, n_pad - n), (0, 0)))
        targets_p = jnp.pad(targets_p, ((0, n_pad - n),))
    targets_2d = targets_p.reshape(n_pad, 1)
    weights_2d = weights.reshape(1, c).astype(jnp.float32)

    cost = pl.CostEstimate(
        flops=6 * n_pad * c,
        transcendentals=2 * n_pad * c,
        bytes_accessed=n_pad * c * itemsize + 4 * n_pad + 4 * c + 4 * n_pad,
    )

    batch_loss = pl.pallas_call(
        _bce_balance_kernel,
        out_shape=jax.ShapeDtypeStruct((num_tiles, 1, tile_n), jnp.float32),
        grid=(num_tiles,),
        in_specs=[
            pl.BlockSpec((tile_n, c), lambda i: (i, 0)),   # logits tile
            pl.BlockSpec((tile_n, 1), lambda i: (i, 0)),   # targets tile
            pl.BlockSpec((1, c), lambda i: (0, 0)),        # class weights (shared)
        ],
        out_specs=pl.BlockSpec((1, 1, tile_n), lambda i: (i, 0, 0)),
        compiler_params=pltpu.CompilerParams(
            dimension_semantics=("parallel",),
            vmem_limit_bytes=32 * 1024 * 1024,
        ),
        cost_estimate=cost,
    )(logits_p, targets_2d, weights_2d)

    batch_loss = batch_loss.reshape(n_pad)[:n]   # drop row padding
    if size_average is None:
        return batch_loss
    return jnp.mean(batch_loss) if size_average else jnp.sum(batch_loss)


def _reference(logits, targets, weights):
    x = logits.astype(jnp.float32)
    onehot = jax.nn.one_hot(targets, x.shape[1], dtype=jnp.float32)
    bce = jnp.maximum(x, 0.0) - x * onehot + jnp.log1p(jnp.exp(-jnp.abs(x)))
    return jnp.sum(weights[None, :].astype(jnp.float32) * bce, axis=1)


if __name__ == "__main__":
    key = jax.random.PRNGKey(0)

    # --- Test 1: small single-tile case (N=8, C=32), like the module's forward.
    N, C = 8, 32
    k1, k2, k3, k4 = jax.random.split(key, 4)
    logits = jax.random.normal(k1, (N, C), dtype=jnp.float32)
    targets = jax.random.randint(k2, (N,), 0, C, dtype=jnp.int32)
    alpha = np.arange(1, C + 1, dtype=np.float64) * 10.0
    weights = jnp.asarray(_make_balance_weights(C, alpha=alpha, beta=0.99))

    out = bce_balance_loss(logits, targets, weights, size_average=None)
    out = jax.block_until_ready(out)
    np.testing.assert_allclose(
        np.asarray(out), np.asarray(_reference(logits, targets, weights)),
        rtol=1e-5, atol=1e-5)

    # --- Test 2: multi-tile + row-padding path (forced small tile).
    N2, C2 = 200, 160
    logits2 = jax.random.normal(k3, (N2, C2), dtype=jnp.float32)
    targets2 = jax.random.randint(k4, (N2,), 0, C2, dtype=jnp.int32)
    alpha2 = np.arange(1, C2 + 1, dtype=np.float64) * 5.0
    weights2 = jnp.asarray(_make_balance_weights(C2, alpha=alpha2, beta=0.99))

    out2 = bce_balance_loss(logits2, targets2, weights2, size_average=None,
                            tile_n=64)
    out2 = jax.block_until_ready(out2)
    np.testing.assert_allclose(
        np.asarray(out2), np.asarray(_reference(logits2, targets2, weights2)),
        rtol=1e-5, atol=1e-5)

    # --- Also exercise the size_average branches of the module.
    mean_loss = jax.block_until_ready(
        bce_balance_loss(logits, targets, weights, size_average=True))
    sum_loss = jax.block_until_ready(
        bce_balance_loss(logits, targets, weights, size_average=False))
    np.testing.assert_allclose(np.asarray(mean_loss), np.mean(np.asarray(out)),
                               rtol=1e-5, atol=1e-5)
    np.testing.assert_allclose(np.asarray(sum_loss), np.sum(np.asarray(out)),
                               rtol=1e-5, atol=1e-5)

    print("KERNEL_OK")
</pallas_src>

<mosaic_0001>
module attributes {stable_mosaic.version = 11 : i64} {
  func.func @_bce_balance_kernel(%arg0: i32, %arg1: memref<8x32xf32, #tpu.memory_space<vmem>>, %arg2: memref<8x1xi32, #tpu.memory_space<vmem>>, %arg3: memref<1x32xf32, #tpu.memory_space<vmem>>, %arg4: memref<1x1x8xf32, #tpu.memory_space<vmem>>) attributes {dimension_semantics = [#tpu.dimension_semantics<parallel>], iteration_bounds = array<i64: 1>, scalar_prefetch = 0 : i64, scratch_operands = 0 : i64, tpu.core_type = #tpu.core_type<tc>, window_params = [{transform_indices = @transform_0, window_bounds = array<i64: 8, 32>}, {transform_indices = @transform_1, window_bounds = array<i64: 8, 1>}, {pipeline_mode = #tpu.pipeline_mode<synchronous>, transform_indices = @transform_2, window_bounds = array<i64: 1, 32>}, {transform_indices = @transform_3, window_bounds = array<i64: 1, 1, 8>}]} {
    %c0 = arith.constant 0 : index
    %c0_0 = arith.constant 0 : index
    %0 = vector.load %arg1[%c0, %c0_0] : memref<8x32xf32, #tpu.memory_space<vmem>>, vector<8x32xf32>
    %c0_1 = arith.constant 0 : index
    %c0_2 = arith.constant 0 : index
    %1 = vector.load %arg2[%c0_1, %c0_2] : memref<8x1xi32, #tpu.memory_space<vmem>>, vector<8x1xi32>
    %c0_3 = arith.constant 0 : index
    %c0_4 = arith.constant 0 : index
    %2 = vector.load %arg3[%c0_3, %c0_4] : memref<1x32xf32, #tpu.memory_space<vmem>>, vector<1x32xf32>
    %3 = tpu.iota {dimensions = array<i32: 1>} : vector<8x32xi32>
    %cst = arith.constant 0.000000e+00 : f32
    %4 = vector.broadcast %cst : f32 to vector<8x32xf32>
    %5 = arith.maximumf %0, %4 : vector<8x32xf32>
    %6 = math.absf %0 : vector<8x32xf32>
    %cst_5 = arith.constant 0.000000e+00 : f32
    %7 = vector.broadcast %cst_5 : f32 to vector<8x32xf32>
    %8 = arith.subf %7, %6 : vector<8x32xf32>
    %9 = math.exp %8 : vector<8x32xf32>
    %10 = math.log1p %9 : vector<8x32xf32>
    %11 = arith.addf %5, %10 : vector<8x32xf32>
    %12 = vector.broadcast %1 : vector<8x1xi32> to vector<8x32xi32>
    %13 = arith.cmpi eq, %3, %12 : vector<8x32xi32>
    %14 = arith.subf %11, %0 : vector<8x32xf32>
    %15 = arith.select %13, %14, %11 : vector<8x32xi1>, vector<8x32xf32>
    %16 = vector.broadcast %2 : vector<1x32xf32> to vector<8x32xf32>
    %17 = arith.mulf %16, %15 : vector<8x32xf32>
    %cst_6 = arith.constant dense<0.000000e+00> : vector<8xf32>
    %18 = vector.multi_reduction <add>, %17, %cst_6 [1] : vector<8x32xf32> to vector<8xf32>
    %c0_7 = arith.constant 0 : index
    %c0_8 = arith.constant 0 : index
    %c0_9 = arith.constant 0 : index
    %19 = vector.load %arg4[%c0_7, %c0_8, %c0_9] : memref<1x1x8xf32, #tpu.memory_space<vmem>>, vector<1x1x8xf32>
    %20 = vector.shape_cast %19 : vector<1x1x8xf32> to vector<8xf32>
    %21 = vector.shape_cast %18 : vector<8xf32> to vector<1x1x8xf32>
    tpu.vector_store %arg4[%c0_7, %c0_8, %c0_9], %21 {strides = array<i32>} : memref<1x1x8xf32, #tpu.memory_space<vmem>>, vector<1x1x8xf32>,
    return
  }
  func.func @transform_0(%arg0: i32) -> (i32, i32) {
    %c0_i32 = arith.constant 0 : i32
    %c0_i32_0 = arith.constant 0 : i32
    return %arg0, %c0_i32 : i32, i32
  }
  func.func @transform_1(%arg0: i32) -> (i32, i32) {
    %c0_i32 = arith.constant 0 : i32
    %c0_i32_0 = arith.constant 0 : i32
    return %arg0, %c0_i32 : i32, i32
  }
  func.func @transform_2(%arg0: i32) -> (i32, i32) {
    %c0_i32 = arith.constant 0 : i32
    %c0_i32_0 = arith.constant 0 : i32
    %c0_i32_1 = arith.constant 0 : i32
    return %c0_i32, %c0_i32_0 : i32, i32
  }
  func.func @transform_3(%arg0: i32) -> (i32, i32, i32) {
    %c0_i32 = arith.constant 0 : i32
    %c0_i32_0 = arith.constant 0 : i32
    %c0_i32_1 = arith.constant 0 : i32
    return %arg0, %c0_i32, %c0_i32_0 : i32, i32, i32
  }
}

</mosaic_0001>

<bundles_post_ra>
// kernel: tpu_custom_call.1
= control target key start
LH: loop header
LB: loop body
LE: loop exit
PB: predicated region body
PF: predicated region fallthrough
CT: control target
= control target key end

     0   :  { %s149_s0 = inlined_call_operand.vmem [shape: f32[8,32], index: 0, kind: input, shape index: {}]   ;;  %s150_s1 = inlined_call_operand.vmem [shape: s32[8,1], index: 1, kind: input, shape index: {}]   ;;  %s151_s2 = inlined_call_operand.vmem [shape: f32[1,32], index: 2, kind: input, shape index: {}]   ;;  %s152_s3 = inlined_call_operand.hbm [shape: f32[1,1,8], index: 3, kind: output, shape index: {}]  }
   0x1   :  { %v16_v0 = vld [vmem:[%s150_s1] sm:$0xff] }
   0x2   :  { %8 = vsyncpa [#allocation3], 0  ;;  %v106_v1 = vmov 0   ;;  %v15_v2 = vld [vmem:[%s149_s0] sm:$0xff]  ;;  %v18_v16 = vlaneseq  ;;  %vm48_vm2 = vcmask 261120   ;;  %s107_s16 = smov [#allocation2]  }
   0x3   :  { %77 = vset.pattern.permute.xlu0 %v106_v1  ;;  %v21_v3 = vand.u32 2147483647, %v15_v2  ;;  %v20_v14 = vmax.f32 %v15_v2, 0.0  ;;  %v74_v21 = vld [vmem:[%s151_s2] ss:$0 sm:$0xff]  ;;  %s66_s17 = sshll.u32 %s107_s16, 4  ;;  %s67_s17 = int_to_ptr.vmem [resolvable:$true] %s66_s17 }
   0x4   :  { %36 = vperm.xlu0 %77, %v16_v0   ;;  %v19_v18 = vand.u32 127, %v18_v16  ;;  %v54_v25 = vshrl.u32 %v18_v16, 7  ;;  %vm58_vm3 = vcmask 57344   ;;  %s82_s18 = scalar_lea.vmem %s67_s17, 16  ;;  %s86_s19 = scalar_lea.vmem %s67_s17, 32 }
   0x5   :  { %v22_v4 = vsub.f32 0.0, %v21_v3  ;;  %p83_p0 = scmp.ne.s32.totalorder %s67_s17, %s82_s18  ;;  %p87_p1 = scmp.lt.s32.totalorder %s67_s17, %s67_s17 }
   0x6   :  { %v55_v26 = vsub.s32 %v19_v18, %v54_v25  ;;  %p88_p2 = scmp.lt.s32.totalorder %s86_s19, %s82_s18 }
   0x7   :  { %v23_v5 = vmul.f32 1.442695, %v22_v4 }
   0x8   :  { %p89_p3 = por %p88_p2, %p87_p1 }
   0x9   :  { %78 = vpow2.f32 %v23_v5 }
   0xa   :  { %p90_p4 = pnand %p89_p3, %p83_p0 }
  0x13   :  { %v79_v6 = vpop.eup %78 }
  0x14   :  { %v25_v7 = vadd.f32 1.0, %v79_v6  ;;  %v28_v8 = vmul.f32 -0.5, %v79_v6  ;;  %v31_v11 = vand.u32 2147483647, %v79_v6 }
  0x16   :  { %80 = vlog2.f32 %v25_v7  ;;  %v29_v9 = vadd.f32 1.0, %v28_v8  ;;  %vm32_vm0 = vcmp.lt.f32.partialorder %v31_v11, 0.0004427343 }
  0x18   :  { %v30_v13 = vmul.f32 %v79_v6, %v29_v9 }
  0x20   :  { %v81_v10 = vpop.eup %80 }
  0x21   :  { %v27_v12 = vmul.f32 0.6931472, %v81_v10 }
  0x23   :  { %v33_v15 = vsel %vm32_vm0, %v30_v13, %v27_v12 }
  0x24   :  { %v34_v17 = vadd.f32 %v33_v15, %v20_v14 }
  0x26   :  { %v39_v19 = vsub.f32 %v34_v17, %v15_v2 }
  0x83   :  { %v37_v20 = vpop.permute.xlu0 %36 }
  0x84   :  { %vm38_vm1 = vcmp.eq.s32.totalorder %v19_v18, %v37_v20 }
  0x85   :  { %v40_v22 = vsel %vm38_vm1, %v39_v19, %v34_v17 }
  0x86   :  { %v47_v23 = vmul.f32 %v74_v21, %v40_v22 }
  0x88   :  { %v49_v24 = vsel %vm48_vm2, %v47_v23, 0.0 }
  0x89   :  { %50 = vadd.xlane.f32.xlu0 %v49_v24 }
 0x116   :  { %v51_v27 = vpop.xlane.xlu0 %50 }
 0x117   :  { %v56_v28 = vrot.slane %v51_v27, %v55_v26 }
 0x119   :  { %59 = vst.msk [vmem:[#allocation2] sm:$0x1] %vm58_vm3, %v56_v28 }
 0x11a   :  { %93 = shalt.err (!%p90_p4)
}
 0x11b   :  { %s94_s21 = scalar_lea.hbm %s152_s3, 16 }
 0x11c   :  { %p95_p5 = scmp.ne.s32.totalorder %s152_s3, %s94_s21  ;;  %p98_p6 = scmp.lt.u32.totalorder %s94_s21, %s152_s3 }
 0x11e   :  { %p100_p7 = pnand %p98_p6, %p95_p5 }
 0x120   :  { %103 = shalt.err (!%p100_p7)
}
 0x121   :  { %69 = dma.vmem_to_hbm [thread:$0]  %s67_s17, 16, %s152_s3, [#allocation3]  }
 0x122   :  { %104 = dma.done.wait [#allocation3], 16  }
 0x123   :  { %105 = vsyncadd [#allocation3], 4294967280 }
 0x124   :  { %73 = vsyncpa [#allocation3], 1 }

</bundles_post_ra>
